<compile_context>
chip_gen: v5e
topology: v5e:2x2
jax: 0.10.0
libtpu: 0.0.40
codegen_flags: <defaults>
</compile_context>

<pallas_src>
import jax
import jax.numpy as jnp
from jax.experimental import pallas as pl
from jax.experimental.pallas import tpu as pltpu


def gru_kernel(x_ref, wih_ref, whh_ref, bi_ref, bhn_ref, out_ref, h_ref):
    """One seq chunk of a single-layer GRU.

    x_ref   : (block_seq*b_pad, E)  embedded tokens for this chunk (time-major rows)
    wih_ref : (E, 3H)  fused W_ih^T  (gate order r, z, n)
    whh_ref : (H, 3H)  fused W_hh^T
    bi_ref  : (1, 3H)  [b_ih_r+b_hh_r, b_ih_z+b_hh_z, b_ih_n]
    bhn_ref : (1, H)   b_hh_n  (must stay inside the r*(...) term)
    out_ref : (block_seq, b_pad, H) per-step hidden states for this chunk
    h_ref   : (b_pad, H) f32 scratch — hidden-state carry across grid steps
    """
    block_seq, b_pad, H = out_ref.shape

    @pl.when(pl.program_id(0) == 0)
    def _init():
        h_ref[...] = jnp.zeros_like(h_ref)

    # --- Preamble: fused input projection for the whole chunk (one MXU matmul,
    # no recurrent dependency). f32 accumulation, bias folded in.
    gi = jnp.dot(x_ref[...], wih_ref[...],
                 preferred_element_type=jnp.float32) + bi_ref[...]   # (block_seq*b_pad, 3H)

    whh = whh_ref[...]
    b_hn = bhn_ref[...]
    mxu_dtype = whh.dtype

    # --- Serial recurrence: one fused h @ W_hh per step + f32 gate math.
    # The chunk is small & static, so a static unroll gives the LLO scheduler
    # full visibility; long sequences are chunked by the grid, not this loop.
    h = h_ref[...]                                                   # (b_pad, H) f32
    for t in range(block_seq):
        lo = t * b_pad                                               # b_pad % 8 == 0 -> aligned rows
        gh = jnp.dot(h.astype(mxu_dtype), whh,
                     preferred_element_type=jnp.float32)             # (b_pad, 3H)
        gi_t = gi[lo:lo + b_pad]
        r = jax.nn.sigmoid(gi_t[:, 0:H] + gh[:, 0:H])
        z = jax.nn.sigmoid(gi_t[:, H:2 * H] + gh[:, H:2 * H])
        n = jnp.tanh(gi_t[:, 2 * H:3 * H] + r * (gh[:, 2 * H:3 * H] + b_hn))
        h = (1.0 - z) * n + z * h
        out_ref[t] = h.astype(out_ref.dtype)                         # aligned (8,H) VMEM store
    h_ref[...] = h                                                   # carry to next chunk


def _pad_tile_bytes(shape, dtype):
    """Bytes of a VMEM tile after (8, 128) padding of the minor two dims."""
    itemsize = jnp.dtype(dtype).itemsize
    s = (1, 1) + tuple(int(d) for d in shape)
    lead = 1
    for d in s[:-2]:
        lead *= d
    sub = -(-s[-2] // 8) * 8
    lane = -(-s[-1] // 128) * 128
    return lead * sub * lane * itemsize


def encoder_forward(tokens, emb_table, w_ih, w_hh, b_ih, b_hh,
                    *, block_seq=None, compute_dtype=jnp.bfloat16):
    """tokens: (seq, B) int32. Returns (output (seq,B,H) f32, hidden (1,B,H) f32)."""
    seq, B = tokens.shape
    E = emb_table.shape[1]
    H = w_hh.shape[1]
    assert w_ih.shape == (3 * H, E) and w_hh.shape == (3 * H, H)

    if block_seq is None:
        block_seq = min(seq, 16)
    assert seq % block_seq == 0, "seq must be divisible by block_seq"
    n_seq = seq // block_seq

    # Pad batch to the 8-sublane granule: per-step slices / stores become clean
    # tiles and it costs nothing on the VPU (a (B<8, H) tile already fills a
    # masked vreg). Padded rows are dropped in the wrapper.
    b_pad = -(-max(B, 8) // 8) * 8

    # --- Embedding gather (plain-JAX glue feeding the kernel). ---
    # TODO(synk): fuse the gather into the kernel (scalar-prefetch token ids +
    # per-chunk DMA gather from an HBM-resident table) to avoid the extra HBM
    # round trip for `embedded`.
    embedded = jnp.take(emb_table, tokens, axis=0)                    # (seq, B, E) f32
    if b_pad != B:
        embedded = jnp.pad(embedded, ((0, 0), (0, b_pad - B), (0, 0)))
    x_flat = embedded.reshape(seq * b_pad, E).astype(compute_dtype)   # time-major rows

    # --- Fused + transposed weights (PyTorch gate order r, z, n), MXU dtype. ---
    wih_cat = w_ih.T.astype(compute_dtype)                            # (E, 3H)
    whh_cat = w_hh.T.astype(compute_dtype)                            # (H, 3H)
    # Input-projection bias: r/z parts fully folded (b_ih + b_hh); n part keeps
    # only b_ih (b_hh_n must remain inside the r*(...) term).
    bi_cat = jnp.concatenate([b_ih[:2 * H] + b_hh[:2 * H],
                              b_ih[2 * H:3 * H]])[None, :].astype(jnp.float32)   # (1, 3H)
    b_hn = b_hh[2 * H:3 * H][None, :].astype(jnp.float32)                        # (1, H)

    # --- Explicit VMEM budget (v7x: 64 MiB physical / 32 MiB default scoped). ---
    est = (2 * _pad_tile_bytes((block_seq * b_pad, E), compute_dtype)        # x, double-buffered
           + 2 * _pad_tile_bytes((block_seq, b_pad, H), jnp.float32)         # out, double-buffered
           + 2 * (_pad_tile_bytes((E, 3 * H), compute_dtype)
                  + _pad_tile_bytes((H, 3 * H), compute_dtype)
                  + _pad_tile_bytes((1, 3 * H), jnp.float32)
                  + _pad_tile_bytes((1, H), jnp.float32))                    # weights / biases
           + _pad_tile_bytes((b_pad, H), jnp.float32)                        # h carry scratch
           + _pad_tile_bytes((block_seq * b_pad, 3 * H), jnp.float32))       # gi temporary
    vmem_limit = int(min(max(2 * est + (1 << 20), 4 << 20), 64 << 20))

    itemsize = jnp.dtype(compute_dtype).itemsize
    cost = pl.CostEstimate(
        flops=2 * seq * b_pad * E * 3 * H + 2 * seq * b_pad * H * 3 * H,
        transcendentals=3 * seq * b_pad * H,
        bytes_accessed=(x_flat.size * itemsize
                        + wih_cat.size * itemsize + whh_cat.size * itemsize
                        + (bi_cat.size + b_hn.size) * 4
                        + seq * b_pad * H * 4),
    )

    # TODO(synk): for v7x megacore, add a leading "parallel" grid axis over
    # batch chunks (independent recurrences) while keeping seq "arbitrary".
    out = pl.pallas_call(
        gru_kernel,
        out_shape=jax.ShapeDtypeStruct((seq, b_pad, H), jnp.float32),
        grid=(n_seq,),
        in_specs=[
            pl.BlockSpec((block_seq * b_pad, E), lambda s: (s, 0)),
            pl.BlockSpec((E, 3 * H), lambda s: (0, 0)),
            pl.BlockSpec((H, 3 * H), lambda s: (0, 0)),
            pl.BlockSpec((1, 3 * H), lambda s: (0, 0)),
            pl.BlockSpec((1, H), lambda s: (0, 0)),
        ],
        out_specs=pl.BlockSpec((block_seq, b_pad, H), lambda s: (s, 0, 0)),
        scratch_shapes=[pltpu.VMEM((b_pad, H), jnp.float32)],
        compiler_params=pltpu.CompilerParams(
            dimension_semantics=("arbitrary",),        # seq axis carries the h state
            vmem_limit_bytes=vmem_limit),
        cost_estimate=cost,
    )(x_flat, wih_cat, whh_cat, bi_cat, b_hn)

    out = out[:, :B, :]                                               # drop batch padding
    hidden = out[-1:, :, :]                                           # (1, B, H) — free slice
    return out, hidden


def reference_forward(tokens, emb_table, w_ih, w_hh, b_ih, b_hh):
    """Pure-JAX f32 reference matching torch.nn.GRU semantics."""
    H = w_hh.shape[1]
    embedded = jnp.take(emb_table, tokens, axis=0)                    # (seq, B, E)

    def step(h, x):
        gi = x @ w_ih.T + b_ih
        gh = h @ w_hh.T + b_hh
        r = jax.nn.sigmoid(gi[:, 0:H] + gh[:, 0:H])
        z = jax.nn.sigmoid(gi[:, H:2 * H] + gh[:, H:2 * H])
        n = jnp.tanh(gi[:, 2 * H:3 * H] + r * gh[:, 2 * H:3 * H])
        h_new = (1.0 - z) * n + z * h
        return h_new, h_new

    h0 = jnp.zeros((tokens.shape[1], H), jnp.float32)
    hN, outs = jax.lax.scan(step, h0, embedded)
    return outs, hN[None]


if __name__ == "__main__":
    # Small shapes consistent with the module.
    vocab_size = 16        # input_size
    embedding_size = 16
    hidden_size = 32
    seq_len, batch = 8, 2

    key = jax.random.PRNGKey(0)
    k_emb, k_wih, k_whh, k_bih, k_bhh, k_tok = jax.random.split(key, 6)

    emb_table = jax.random.normal(k_emb, (vocab_size, embedding_size), jnp.float32)
    bound = float(1.0 / (hidden_size ** 0.5))
    w_ih = jax.random.uniform(k_wih, (3 * hidden_size, embedding_size),
                              jnp.float32, -bound, bound)
    w_hh = jax.random.uniform(k_whh, (3 * hidden_size, hidden_size),
                              jnp.float32, -bound, bound)
    b_ih = jax.random.uniform(k_bih, (3 * hidden_size,), jnp.float32, -bound, bound)
    b_hh = jax.random.uniform(k_bhh, (3 * hidden_size,), jnp.float32, -bound, bound)
    tokens = jax.random.randint(k_tok, (seq_len, batch), 0, vocab_size, jnp.int32)

    out_ref_, hidden_ref_ = reference_forward(tokens, emb_table, w_ih, w_hh, b_ih, b_hh)

    # block_seq=4 -> 2 grid steps: exercises the h-carry across grid iterations.
    out, hidden = encoder_forward(tokens, emb_table, w_ih, w_hh, b_ih, b_hh,
                                  block_seq=4, compute_dtype=jnp.bfloat16)
    jax.block_until_ready((out, hidden))
    assert out.shape == (seq_len, batch, hidden_size)
    assert hidden.shape == (1, batch, hidden_size)
    # bf16 MXU inputs -> relaxed tolerance vs. the f32 reference.
    assert jnp.allclose(out, out_ref_, rtol=3e-2, atol=3e-2)
    assert jnp.allclose(hidden, hidden_ref_, rtol=3e-2, atol=3e-2)

    # f32 path: tight check of the recurrence / bias folding / gate order.
    out32, hidden32 = encoder_forward(tokens, emb_table, w_ih, w_hh, b_ih, b_hh,
                                      block_seq=4, compute_dtype=jnp.float32)
    jax.block_until_ready((out32, hidden32))
    assert jnp.allclose(out32, out_ref_, rtol=1e-5, atol=1e-5)
    assert jnp.allclose(hidden32, hidden_ref_, rtol=1e-5, atol=1e-5)

    print("KERNEL_OK")
</pallas_src>

<mosaic_0001>
module attributes {stable_mosaic.version = 11 : i64} {
  func.func @gru_kernel(%arg0: i32, %arg1: memref<32x16xbf16, #tpu.memory_space<vmem>>, %arg2: memref<16x96xbf16, #tpu.memory_space<vmem>>, %arg3: memref<32x96xbf16, #tpu.memory_space<vmem>>, %arg4: memref<1x96xf32, #tpu.memory_space<vmem>>, %arg5: memref<1x32xf32, #tpu.memory_space<vmem>>, %arg6: memref<4x8x32xf32, #tpu.memory_space<vmem>>, %arg7: memref<8x32xf32, #tpu.memory_space<vmem>>) attributes {dimension_semantics = [#tpu.dimension_semantics<arbitrary>], iteration_bounds = array<i64: 2>, scalar_prefetch = 0 : i64, scratch_operands = 1 : i64, tpu.core_type = #tpu.core_type<tc>, window_params = [{transform_indices = @transform_0, window_bounds = array<i64: 32, 16>}, {pipeline_mode = #tpu.pipeline_mode<synchronous>, transform_indices = @transform_1, window_bounds = array<i64: 16, 96>}, {pipeline_mode = #tpu.pipeline_mode<synchronous>, transform_indices = @transform_2, window_bounds = array<i64: 32, 96>}, {pipeline_mode = #tpu.pipeline_mode<synchronous>, transform_indices = @transform_3, window_bounds = array<i64: 1, 96>}, {pipeline_mode = #tpu.pipeline_mode<synchronous>, transform_indices = @transform_4, window_bounds = array<i64: 1, 32>}, {transform_indices = @transform_5, window_bounds = array<i64: 4, 8, 32>}]} {
    %c0_i32 = arith.constant 0 : i32
    %0 = arith.cmpi eq, %arg0, %c0_i32 : i32
    %1 = arith.extui %0 : i1 to i32
    %c0_i32_0 = arith.constant 0 : i32
    %2 = arith.cmpi ne, %1, %c0_i32_0 : i32
    scf.if %2 {
      %cst_39 = arith.constant 0.000000e+00 : f32
      %149 = vector.broadcast %cst_39 : f32 to vector<8x32xf32>
      %c0_40 = arith.constant 0 : index
      %c0_41 = arith.constant 0 : index
      %150 = vector.load %arg7[%c0_40, %c0_41] : memref<8x32xf32, #tpu.memory_space<vmem>>, vector<8x32xf32>
      tpu.vector_store %arg7[%c0_40, %c0_41], %149 {strides = array<i32>} : memref<8x32xf32, #tpu.memory_space<vmem>>, vector<8x32xf32>,
    } else {
    }
    %c0 = arith.constant 0 : index
    %c0_1 = arith.constant 0 : index
    %3 = vector.load %arg1[%c0, %c0_1] : memref<32x16xbf16, #tpu.memory_space<vmem>>, vector<32x16xbf16>
    %c0_2 = arith.constant 0 : index
    %c0_3 = arith.constant 0 : index
    %4 = vector.load %arg2[%c0_2, %c0_3] : memref<16x96xbf16, #tpu.memory_space<vmem>>, vector<16x96xbf16>
    %cst = arith.constant dense<0.000000e+00> : vector<32x96xf32>
    %5 = tpu.matmul %3, %4, %cst {dimension_numbers = #tpu.dot_dimension_numbers<[1], [0], [0], [1], [0, 0, 1, 1], [], []>} : vector<32x16xbf16>, vector<16x96xbf16>, vector<32x96xf32> -> vector<32x96xf32>
    %c0_4 = arith.constant 0 : index
    %c0_5 = arith.constant 0 : index
    %6 = vector.load %arg4[%c0_4, %c0_5] : memref<1x96xf32, #tpu.memory_space<vmem>>, vector<1x96xf32>
    %7 = vector.broadcast %6 : vector<1x96xf32> to vector<32x96xf32>
    %8 = arith.addf %5, %7 : vector<32x96xf32>
    %c0_6 = arith.constant 0 : index
    %c0_7 = arith.constant 0 : index
    %9 = vector.load %arg3[%c0_6, %c0_7] : memref<32x96xbf16, #tpu.memory_space<vmem>>, vector<32x96xbf16>
    %c0_8 = arith.constant 0 : index
    %c0_9 = arith.constant 0 : index
    %10 = vector.load %arg5[%c0_8, %c0_9] : memref<1x32xf32, #tpu.memory_space<vmem>>, vector<1x32xf32>
    %c0_10 = arith.constant 0 : index
    %c0_11 = arith.constant 0 : index
    %11 = vector.load %arg7[%c0_10, %c0_11] : memref<8x32xf32, #tpu.memory_space<vmem>>, vector<8x32xf32>
    %12 = arith.truncf %11 : vector<8x32xf32> to vector<8x32xbf16>
    %cst_12 = arith.constant dense<0.000000e+00> : vector<8x96xf32>
    %13 = tpu.matmul %12, %9, %cst_12 {dimension_numbers = #tpu.dot_dimension_numbers<[1], [0], [0], [1], [0, 0, 1, 1], [], []>} : vector<8x32xbf16>, vector<32x96xbf16>, vector<8x96xf32> -> vector<8x96xf32>
    %14 = vector.extract_strided_slice %8 {offsets = [0, 0], sizes = [8, 96], strides = [1, 1]} : vector<32x96xf32> to vector<8x96xf32>
    %15 = vector.extract_strided_slice %14 {offsets = [0, 0], sizes = [8, 32], strides = [1, 1]} : vector<8x96xf32> to vector<8x32xf32>
    %16 = vector.extract_strided_slice %13 {offsets = [0, 0], sizes = [8, 32], strides = [1, 1]} : vector<8x96xf32> to vector<8x32xf32>
    %17 = arith.addf %15, %16 : vector<8x32xf32>
    %18 = arith.negf %17 : vector<8x32xf32>
    %19 = math.exp %18 : vector<8x32xf32>
    %cst_13 = arith.constant 1.000000e+00 : f32
    %20 = vector.broadcast %cst_13 : f32 to vector<8x32xf32>
    %21 = arith.addf %20, %19 : vector<8x32xf32>
    %22 = arith.divf %20, %21 : vector<8x32xf32>
    %23 = vector.extract_strided_slice %14 {offsets = [0, 32], sizes = [8, 32], strides = [1, 1]} : vector<8x96xf32> to vector<8x32xf32>
    %24 = vector.extract_strided_slice %13 {offsets = [0, 32], sizes = [8, 32], strides = [1, 1]} : vector<8x96xf32> to vector<8x32xf32>
    %25 = arith.addf %23, %24 : vector<8x32xf32>
    %26 = arith.negf %25 : vector<8x32xf32>
    %27 = math.exp %26 : vector<8x32xf32>
    %cst_14 = arith.constant 1.000000e+00 : f32
    %28 = vector.broadcast %cst_14 : f32 to vector<8x32xf32>
    %29 = arith.addf %28, %27 : vector<8x32xf32>
    %30 = arith.divf %28, %29 : vector<8x32xf32>
    %31 = vector.extract_strided_slice %14 {offsets = [0, 64], sizes = [8, 32], strides = [1, 1]} : vector<8x96xf32> to vector<8x32xf32>
    %32 = vector.extract_strided_slice %13 {offsets = [0, 64], sizes = [8, 32], strides = [1, 1]} : vector<8x96xf32> to vector<8x32xf32>
    %33 = vector.broadcast %10 : vector<1x32xf32> to vector<8x32xf32>
    %34 = arith.addf %32, %33 : vector<8x32xf32>
    %35 = arith.mulf %22, %34 : vector<8x32xf32>
    %36 = arith.addf %31, %35 : vector<8x32xf32>
    %37 = math.tanh %36 : vector<8x32xf32>
    %cst_15 = arith.constant 1.000000e+00 : f32
    %38 = vector.broadcast %cst_15 : f32 to vector<8x32xf32>
    %39 = arith.subf %38, %30 : vector<8x32xf32>
    %40 = arith.mulf %39, %37 : vector<8x32xf32>
    %41 = arith.mulf %30, %11 : vector<8x32xf32>
    %42 = arith.addf %40, %41 : vector<8x32xf32>
    %c0_16 = arith.constant 0 : index
    %c0_17 = arith.constant 0 : index
    %c0_18 = arith.constant 0 : index
    %43 = vector.load %arg6[%c0_16, %c0_17, %c0_18] : memref<4x8x32xf32, #tpu.memory_space<vmem>>, vector<1x8x32xf32>
    %44 = vector.shape_cast %43 : vector<1x8x32xf32> to vector<8x32xf32>
    %45 = vector.shape_cast %42 : vector<8x32xf32> to vector<1x8x32xf32>
    tpu.vector_store %arg6[%c0_16, %c0_17, %c0_18], %45 {strides = array<i32>} : memref<4x8x32xf32, #tpu.memory_space<vmem>>, vector<1x8x32xf32>,
    %46 = arith.truncf %42 : vector<8x32xf32> to vector<8x32xbf16>
    %cst_19 = arith.constant dense<0.000000e+00> : vector<8x96xf32>
    %47 = tpu.matmul %46, %9, %cst_19 {dimension_numbers = #tpu.dot_dimension_numbers<[1], [0], [0], [1], [0, 0, 1, 1], [], []>} : vector<8x32xbf16>, vector<32x96xbf16>, vector<8x96xf32> -> vector<8x96xf32>
    %48 = vector.extract_strided_slice %8 {offsets = [8, 0], sizes = [8, 96], strides = [1, 1]} : vector<32x96xf32> to vector<8x96xf32>
    %49 = vector.extract_strided_slice %48 {offsets = [0, 0], sizes = [8, 32], strides = [1, 1]} : vector<8x96xf32> to vector<8x32xf32>
    %50 = vector.extract_strided_slice %47 {offsets = [0, 0], sizes = [8, 32], strides = [1, 1]} : vector<8x96xf32> to vector<8x32xf32>
    %51 = arith.addf %49, %50 : vector<8x32xf32>
    %52 = arith.negf %51 : vector<8x32xf32>
    %53 = math.exp %52 : vector<8x32xf32>
    %cst_20 = arith.constant 1.000000e+00 : f32
    %54 = vector.broadcast %cst_20 : f32 to vector<8x32xf32>
    %55 = arith.addf %54, %53 : vector<8x32xf32>
    %56 = arith.divf %54, %55 : vector<8x32xf32>
    %57 = vector.extract_strided_slice %48 {offsets = [0, 32], sizes = [8, 32], strides = [1, 1]} : vector<8x96xf32> to vector<8x32xf32>
    %58 = vector.extract_strided_slice %47 {offsets = [0, 32], sizes = [8, 32], strides = [1, 1]} : vector<8x96xf32> to vector<8x32xf32>
    %59 = arith.addf %57, %58 : vector<8x32xf32>
    %60 = arith.negf %59 : vector<8x32xf32>
    %61 = math.exp %60 : vector<8x32xf32>
    %cst_21 = arith.constant 1.000000e+00 : f32
    %62 = vector.broadcast %cst_21 : f32 to vector<8x32xf32>
    %63 = arith.addf %62, %61 : vector<8x32xf32>
    %64 = arith.divf %62, %63 : vector<8x32xf32>
    %65 = vector.extract_strided_slice %48 {offsets = [0, 64], sizes = [8, 32], strides = [1, 1]} : vector<8x96xf32> to vector<8x32xf32>
    %66 = vector.extract_strided_slice %47 {offsets = [0, 64], sizes = [8, 32], strides = [1, 1]} : vector<8x96xf32> to vector<8x32xf32>
    %67 = vector.broadcast %10 : vector<1x32xf32> to vector<8x32xf32>
    %68 = arith.addf %66, %67 : vector<8x32xf32>
    %69 = arith.mulf %56, %68 : vector<8x32xf32>
    %70 = arith.addf %65, %69 : vector<8x32xf32>
    %71 = math.tanh %70 : vector<8x32xf32>
    %cst_22 = arith.constant 1.000000e+00 : f32
    %72 = vector.broadcast %cst_22 : f32 to vector<8x32xf32>
    %73 = arith.subf %72, %64 : vector<8x32xf32>
    %74 = arith.mulf %73, %71 : vector<8x32xf32>
    %75 = arith.mulf %64, %42 : vector<8x32xf32>
    %76 = arith.addf %74, %75 : vector<8x32xf32>
    %c1 = arith.constant 1 : index
    %c0_23 = arith.constant 0 : index
    %c0_24 = arith.constant 0 : index
    %77 = vector.load %arg6[%c1, %c0_23, %c0_24] : memref<4x8x32xf32, #tpu.memory_space<vmem>>, vector<1x8x32xf32>
    %78 = vector.shape_cast %77 : vector<1x8x32xf32> to vector<8x32xf32>
    %79 = vector.shape_cast %76 : vector<8x32xf32> to vector<1x8x32xf32>
    tpu.vector_store %arg6[%c1, %c0_23, %c0_24], %79 {strides = array<i32>} : memref<4x8x32xf32, #tpu.memory_space<vmem>>, vector<1x8x32xf32>,
    %80 = arith.truncf %76 : vector<8x32xf32> to vector<8x32xbf16>
    %cst_25 = arith.constant dense<0.000000e+00> : vector<8x96xf32>
    %81 = tpu.matmul %80, %9, %cst_25 {dimension_numbers = #tpu.dot_dimension_numbers<[1], [0], [0], [1], [0, 0, 1, 1], [], []>} : vector<8x32xbf16>, vector<32x96xbf16>, vector<8x96xf32> -> vector<8x96xf32>
    %82 = vector.extract_strided_slice %8 {offsets = [16, 0], sizes = [8, 96], strides = [1, 1]} : vector<32x96xf32> to vector<8x96xf32>
    %83 = vector.extract_strided_slice %82 {offsets = [0, 0], sizes = [8, 32], strides = [1, 1]} : vector<8x96xf32> to vector<8x32xf32>
    %84 = vector.extract_strided_slice %81 {offsets = [0, 0], sizes = [8, 32], strides = [1, 1]} : vector<8x96xf32> to vector<8x32xf32>
    %85 = arith.addf %83, %84 : vector<8x32xf32>
    %86 = arith.negf %85 : vector<8x32xf32>
    %87 = math.exp %86 : vector<8x32xf32>
    %cst_26 = arith.constant 1.000000e+00 : f32
    %88 = vector.broadcast %cst_26 : f32 to vector<8x32xf32>
    %89 = arith.addf %88, %87 : vector<8x32xf32>
    %90 = arith.divf %88, %89 : vector<8x32xf32>
    %91 = vector.extract_strided_slice %82 {offsets = [0, 32], sizes = [8, 32], strides = [1, 1]} : vector<8x96xf32> to vector<8x32xf32>
    %92 = vector.extract_strided_slice %81 {offsets = [0, 32], sizes = [8, 32], strides = [1, 1]} : vector<8x96xf32> to vector<8x32xf32>
    %93 = arith.addf %91, %92 : vector<8x32xf32>
    %94 = arith.negf %93 : vector<8x32xf32>
    %95 = math.exp %94 : vector<8x32xf32>
    %cst_27 = arith.constant 1.000000e+00 : f32
    %96 = vector.broadcast %cst_27 : f32 to vector<8x32xf32>
    %97 = arith.addf %96, %95 : vector<8x32xf32>
    %98 = arith.divf %96, %97 : vector<8x32xf32>
    %99 = vector.extract_strided_slice %82 {offsets = [0, 64], sizes = [8, 32], strides = [1, 1]} : vector<8x96xf32> to vector<8x32xf32>
    %100 = vector.extract_strided_slice %81 {offsets = [0, 64], sizes = [8, 32], strides = [1, 1]} : vector<8x96xf32> to vector<8x32xf32>
    %101 = vector.broadcast %10 : vector<1x32xf32> to vector<8x32xf32>
    %102 = arith.addf %100, %101 : vector<8x32xf32>
    %103 = arith.mulf %90, %102 : vector<8x32xf32>
    %104 = arith.addf %99, %103 : vector<8x32xf32>
    %105 = math.tanh %104 : vector<8x32xf32>
    %cst_28 = arith.constant 1.000000e+00 : f32
    %106 = vector.broadcast %cst_28 : f32 to vector<8x32xf32>
    %107 = arith.subf %106, %98 : vector<8x32xf32>
    %108 = arith.mulf %107, %105 : vector<8x32xf32>
    %109 = arith.mulf %98, %76 : vector<8x32xf32>
    %110 = arith.addf %108, %109 : vector<8x32xf32>
    %c2 = arith.constant 2 : index
    %c0_29 = arith.constant 0 : index
    %c0_30 = arith.constant 0 : index
    %111 = vector.load %arg6[%c2, %c0_29, %c0_30] : memref<4x8x32xf32, #tpu.memory_space<vmem>>, vector<1x8x32xf32>
    %112 = vector.shape_cast %111 : vector<1x8x32xf32> to vector<8x32xf32>
    %113 = vector.shape_cast %110 : vector<8x32xf32> to vector<1x8x32xf32>
    tpu.vector_store %arg6[%c2, %c0_29, %c0_30], %113 {strides = array<i32>} : memref<4x8x32xf32, #tpu.memory_space<vmem>>, vector<1x8x32xf32>,
    %114 = arith.truncf %110 : vector<8x32xf32> to vector<8x32xbf16>
    %cst_31 = arith.constant dense<0.000000e+00> : vector<8x96xf32>
    %115 = tpu.matmul %114, %9, %cst_31 {dimension_numbers = #tpu.dot_dimension_numbers<[1], [0], [0], [1], [0, 0, 1, 1], [], []>} : vector<8x32xbf16>, vector<32x96xbf16>, vector<8x96xf32> -> vector<8x96xf32>
    %116 = vector.extract_strided_slice %8 {offsets = [24, 0], sizes = [8, 96], strides = [1, 1]} : vector<32x96xf32> to vector<8x96xf32>
    %117 = vector.extract_strided_slice %116 {offsets = [0, 0], sizes = [8, 32], strides = [1, 1]} : vector<8x96xf32> to vector<8x32xf32>
    %118 = vector.extract_strided_slice %115 {offsets = [0, 0], sizes = [8, 32], strides = [1, 1]} : vector<8x96xf32> to vector<8x32xf32>
    %119 = arith.addf %117, %118 : vector<8x32xf32>
    %120 = arith.negf %119 : vector<8x32xf32>
    %121 = math.exp %120 : vector<8x32xf32>
    %cst_32 = arith.constant 1.000000e+00 : f32
    %122 = vector.broadcast %cst_32 : f32 to vector<8x32xf32>
    %123 = arith.addf %122, %121 : vector<8x32xf32>
    %124 = arith.divf %122, %123 : vector<8x32xf32>
    %125 = vector.extract_strided_slice %116 {offsets = [0, 32], sizes = [8, 32], strides = [1, 1]} : vector<8x96xf32> to vector<8x32xf32>
    %126 = vector.extract_strided_slice %115 {offsets = [0, 32], sizes = [8, 32], strides = [1, 1]} : vector<8x96xf32> to vector<8x32xf32>
    %127 = arith.addf %125, %126 : vector<8x32xf32>
    %128 = arith.negf %127 : vector<8x32xf32>
    %129 = math.exp %128 : vector<8x32xf32>
    %cst_33 = arith.constant 1.000000e+00 : f32
    %130 = vector.broadcast %cst_33 : f32 to vector<8x32xf32>
    %131 = arith.addf %130, %129 : vector<8x32xf32>
    %132 = arith.divf %130, %131 : vector<8x32xf32>
    %133 = vector.extract_strided_slice %116 {offsets = [0, 64], sizes = [8, 32], strides = [1, 1]} : vector<8x96xf32> to vector<8x32xf32>
    %134 = vector.extract_strided_slice %115 {offsets = [0, 64], sizes = [8, 32], strides = [1, 1]} : vector<8x96xf32> to vector<8x32xf32>
    %135 = vector.broadcast %10 : vector<1x32xf32> to vector<8x32xf32>
    %136 = arith.addf %134, %135 : vector<8x32xf32>
    %137 = arith.mulf %124, %136 : vector<8x32xf32>
    %138 = arith.addf %133, %137 : vector<8x32xf32>
    %139 = math.tanh %138 : vector<8x32xf32>
    %cst_34 = arith.constant 1.000000e+00 : f32
    %140 = vector.broadcast %cst_34 : f32 to vector<8x32xf32>
    %141 = arith.subf %140, %132 : vector<8x32xf32>
    %142 = arith.mulf %141, %139 : vector<8x32xf32>
    %143 = arith.mulf %132, %110 : vector<8x32xf32>
    %144 = arith.addf %142, %143 : vector<8x32xf32>
    %c3 = arith.constant 3 : index
    %c0_35 = arith.constant 0 : index
    %c0_36 = arith.constant 0 : index
    %145 = vector.load %arg6[%c3, %c0_35, %c0_36] : memref<4x8x32xf32, #tpu.memory_space<vmem>>, vector<1x8x32xf32>
    %146 = vector.shape_cast %145 : vector<1x8x32xf32> to vector<8x32xf32>
    %147 = vector.shape_cast %144 : vector<8x32xf32> to vector<1x8x32xf32>
    tpu.vector_store %arg6[%c3, %c0_35, %c0_36], %147 {strides = array<i32>} : memref<4x8x32xf32, #tpu.memory_space<vmem>>, vector<1x8x32xf32>,
    %c0_37 = arith.constant 0 : index
    %c0_38 = arith.constant 0 : index
    %148 = vector.load %arg7[%c0_37, %c0_38] : memref<8x32xf32, #tpu.memory_space<vmem>>, vector<8x32xf32>
    tpu.vector_store %arg7[%c0_37, %c0_38], %144 {strides = array<i32>} : memref<8x32xf32, #tpu.memory_space<vmem>>, vector<8x32xf32>,
    return
  }
  func.func @transform_0(%arg0: i32) -> (i32, i32) {
    %c0_i32 = arith.constant 0 : i32
    %c0_i32_0 = arith.constant 0 : i32
    return %arg0, %c0_i32 : i32, i32
  }
  func.func @transform_1(%arg0: i32) -> (i32, i32) {
    %c0_i32 = arith.constant 0 : i32
    %c0_i32_0 = arith.constant 0 : i32
    %c0_i32_1 = arith.constant 0 : i32
    return %c0_i32, %c0_i32_0 : i32, i32
  }
  func.func @transform_2(%arg0: i32) -> (i32, i32) {
    %c0_i32 = arith.constant 0 : i32
    %c0_i32_0 = arith.constant 0 : i32
    %c0_i32_1 = arith.constant 0 : i32
    return %c0_i32, %c0_i32_0 : i32, i32
  }
  func.func @transform_3(%arg0: i32) -> (i32, i32) {
    %c0_i32 = arith.constant 0 : i32
    %c0_i32_0 = arith.constant 0 : i32
    %c0_i32_1 = arith.constant 0 : i32
    return %c0_i32, %c0_i32_0 : i32, i32
  }
  func.func @transform_4(%arg0: i32) -> (i32, i32) {
    %c0_i32 = arith.constant 0 : i32
    %c0_i32_0 = arith.constant 0 : i32
    %c0_i32_1 = arith.constant 0 : i32
    return %c0_i32, %c0_i32_0 : i32, i32
  }
  func.func @transform_5(%arg0: i32) -> (i32, i32, i32) {
    %c0_i32 = arith.constant 0 : i32
    %c0_i32_0 = arith.constant 0 : i32
    %c0_i32_1 = arith.constant 0 : i32
    return %arg0, %c0_i32, %c0_i32_0 : i32, i32, i32
  }
}

</mosaic_0001>

<bundles_post_ra>
// kernel: tpu_custom_call.1
= control target key start
LH: loop header
LB: loop body
LE: loop exit
PB: predicated region body
PF: predicated region fallthrough
CT: control target
= control target key end

     0   :  { %10 = vsyncpa [#allocation4], 0  ;;  %s1045_s0 = inlined_call_operand.vmem [shape: bf16[64,16], index: 0, kind: input, shape index: {}]   ;;  %s1046_s1 = inlined_call_operand.vmem [shape: bf16[16,96], index: 1, kind: input, shape index: {}]   ;;  %s1047_s2 = inlined_call_operand.vmem [shape: bf16[32,96], index: 2, kind: input, shape index: {}]   ;;  %s1048_s3 = inlined_call_operand.vmem [shape: f32[1,96], index: 3, kind: input, shape index: {}]   ;;  %s1049_s4 = inlined_call_operand.vmem [shape: f32[1,32], index: 4, kind: input, shape index: {}]   ;;  %s1050_s5 = inlined_call_operand.hbm [shape: f32[8,8,32], index: 5, kind: output, shape index: {}]  }
   0x1   :  { %12 = vsyncpa [#allocation4 + $0x1], 0  ;;  %s875_s18 = smov 0   ;;  %s877_s19 = smov 0  }
   0x2   :  { %s879_s20 = smov 0   ;;  %s881_s21 = smov 0  }
   0x3 LB: > { %s896_s22 = sadd.s32 4294967295, %s837_s21   ;;  %s652_s23 = sadd.s32 4294967294, %s837_s21   ;;  %s837_s21 = sphi %s881_s21, %s1056_s21   ;;  %s833_s20 = sphi %s879_s20, %s1055_s20   ;;  %s829_s19 = sphi %s877_s19, %s1054_s19   ;;  %s825_s18 = sphi %s875_s18, %s1053_s18  }
   0x4   : > { %s900_s24 = sadd.s32 1, %s837_s21   ;;  %s135_s25 = sadd.s32 1, %s833_s20 }
   0x5   : > { %s132_s26 = ssub.s32 %s837_s21, %s900_s24  ;;  %p145_p0 = scmp.ne.s32.totalorder %s833_s20, %s829_s19 }
   0x6   : > { %p133_p1 = scmp.eq.s32.totalorder %s132_s26, 0  ;;  %p146_p2 = scmp.eq.s32.totalorder %s896_s22, 1 }
   0x7   : > { %p151_p3 = scmp.ne.s32.totalorder %s829_s19, %s825_s18  ;;  %p152_p4 = scmp.eq.s32.totalorder %s652_s23, 1 }
   0x8   : > { %s911_s27 = scalar_select %p133_p1, %s833_s20, %s135_s25  }
   0x9   : > { %p913_p5 = por %p146_p2, %p145_p0  ;;  %p917_p6 = por %p152_p4, %p151_p3 }
   0xa   : > { %p655_p7 = scmp.ge.s32.totalorder %s837_s21, 1  ;;  %p191_p8 = scmp.lt.s32.totalorder %s837_s21, 3 }
   0xc   : > { %p192_p9 = pnand %p655_p7, %p191_p8 }
   0xd   : > { %s216_s30 = sand.u32 (!%p192_p9), 1, %s829_s19   ;;  %s657_s6 = sshll.u32 (!%p192_p9), %s896_s22, 2 }
   0xe   : > { %195 = sbr.rel (%p192_p9) target bundleno = 2351 (0x92f), region = 40  ;;  %s656_s7 = sshll.u32 (!%p192_p9), %s216_s30, 5 }
   0xf   : > { %p220_p10 = scmp.lt.s32.totalorder (!%p192_p9), %s657_s6, 7  ;;  %s932_s12 = scalar_lea.vmem (!%p192_p9), [#allocation3], %s656_s7 }
  0x10   : > { %p659_p11 = scmp.ne.s32.totalorder (!%p192_p9), %s896_s22, 0 }
  0x13   : > { %s1058_s6 = smov (!%p220_p10, %s657_s6), 7  ;;  %230 = sbr.rel (%p659_p11) target bundleno = 26 (0x1a), region = 44 }
  0x14   : > { %s658_s8 = sshll.u32 %s1058_s6, 2 }
  0x15   : > { %s930_s11 = scalar_lea.vmem %s1045_s0, %s658_s8 }
  0x18   : > { %vm231_vm0 = vcmask 261120   ;;  %v839_v0 = vmov 0.0  }
  0x19   : > { %232 = vst.msk [vmem:[#allocation2] sm:$0xff] %vm231_vm0, %v839_v0 }
  0x1a PF: > { %v702_v1 = vld [vmem:[%s1047_s2 + $0x8] sm:$0xff]  ;;  %v700_v2 = vld [vmem:[%s1046_s1] sm:$0xff]  ;;  %vm259_vm1 = vcmask 130048   ;;  %s840_s6 = smov 32   ;;  %s841_s7 = smov 64   ;;  %vm304_vm2 = vcmask 261120  }
  0x1b   : > { %v701_v3 = vld [vmem:[%s1047_s2] sm:$0xff]  ;;  %314 = vmatpush.bf16.msra.mxu1 %v702_v1  ;;  %273 = vmatpush.bf16.msra.mxu0 %v700_v2  ;;  %s842_s10 = smov 96   ;;  %s587_s16 = sshll.u32 %s932_s12, 4  ;;  %s588_s16 = int_to_ptr.vmem [resolvable:$true] %s587_s16 }
  0x1c   : > { %v698_v4 = vld [vmem:[%s930_s11] sm:$0xff]  ;;  %388 = vmatpush.bf16.msra.mxu2 %v702_v1  ;;  %454 = vmatpush.bf16.msra.mxu3 %v702_v1  ;;  %s575_s23 = scalar_lea.sflag [#allocation4], %s216_s30 }
  0x1d   : > { %v749_v6 = vld [vmem:[%s1049_s4] ss:$0 sm:$0xff] }
  0x1e   : > { %343 = vrot.lane.b32.xlu0 %v749_v6, %s841_s7  ;;  %672 = vmatmul.msk.bf16.vlgmr.msra.gmra.mxu0 %vm259_vm1, %v698_v4  ;;  %v958_v12 = vld [vmem:[%s1048_s3] ss:$0 sm:$0xff] }
  0x1f   : > { %315 = vmatpush.bf16.msra.mxu1 %v701_v3 }
  0x20   : > { %v290_v5 = vld [vmem:[#allocation2] sm:$0xff]  ;;  %389 = vmatpush.bf16.msra.mxu2 %v701_v3  ;;  %455 = vmatpush.bf16.msra.mxu3 %v701_v3 }
  0x21   : > { %365 = vrot.lane.b32.xlu2 %v290_v5, %s840_s6  ;;  %v291_v7 = vpack.c.bf16 %v290_v5, %v290_v5 }
  0x23   : > { %520 = vmatpush.bf16.msrb.mxu1 %v702_v1 }
  0x24   : > { %682 = vmatmul.msk.bf16.vlgmr.msra.gmra.mxu1 %vm304_vm2, %v291_v7 }
  0x27   : > { %521 = vmatpush.bf16.msrb.mxu1 %v701_v3 }
  0x7b   : > { %v366_v34 = vpop.permute.xlu2 %365 }
  0x90   : > { %v951_v8 = vpop.permute.xlu0 %343 }
  0x9b   : > { %v275_v13 = vpop.f32.mrf.mxu0 }
  0x9c   : > { %v276_v14 = vadd.f32 %v958_v12, %v275_v13 }
  0xa1   : > { %v317_v9 = vpop.f32.mrf.mxu1 }
  0xa2   : > { %v346_v10 = vadd.f32 %v951_v8, %v317_v9  ;;  %v321_v15 = vadd.f32 %v317_v9, %v276_v14  ;;  %v699_v9 = vld [vmem:[%s930_s11 + $0x8] sm:$0xff]  ;;  %s703_s11 = sshll.u32 %s896_s22, 5 }
  0xa3   : > { %v277_v45 = vpop.f32.mrf.mxu0  ;;  %673 = vmatmul.msk.bf16.gmra.mxu0 %vm259_vm1, %v699_v9  ;;  %s586_s15 = scalar_lea.hbm %s1050_s5, %s703_s11 }
  0xa4   : > { %348 = vrot.lane.b32.xlu0 %v346_v10, %s841_s7  ;;  %v683_v16 = vmul.f32 -1.442695, %v321_v15  ;;  %v278_v46 = vadd.f32 %v958_v12, %v277_v45  ;;  %s589_s17 = sshll.u32 %s586_s15, 4  ;;  %s590_s17 = int_to_ptr.hbm [resolvable:$true] %s589_s17 }
  0xa5   : > { %s789_s25 = sshra.s32 %s590_s17, 4  ;;  %s790_s25 = int_to_ptr.hbm [resolvable:$true] %s789_s25 }
  0xa6   : > { %751 = vpow2.f32 %v683_v16  ;;  %s791_s26 = scalar_lea.hbm %s790_s25, 32  ;;  %p796_p1 = scmp.lt.s32.totalorder %s790_s25, %s1050_s5 }
  0xa7   : > { %p792_p12 = scmp.ne.s32.totalorder %s790_s25, %s791_s26 }
  0xa9   : > { %v319_v11 = vpop.f32.mrf.mxu1  ;;  %p793_p13 = pnand %p792_p12, %p913_p5 }
  0xab   : > { %p794_p0 = pneg %p793_p13 }
  0xac   : > { %v752_v17 = vpop.eup %751 }
  0xad   : > { %v325_v18 = vadd.f32 1.0, %v752_v17 }
  0xaf   : > { %753 = vrcp.f32 %v325_v18  ;;  %v337_v24 = vand.u32 2147483648, %v325_v18  ;;  %vm331_vm4 = vweird.f32 %v325_v18  ;;  %v335_v25 = vand.u32 2147483647, %v325_v18 }
  0xb1   : > { %v338_v27 = vor.u32 1.1754944e-38, %v337_v24  ;;  %vm336_vm6 = vcmp.eq.f32.partialorder %v335_v25, 8.507059e+37 }
  0xb5   : > { %v754_v19 = vpop.eup %753 }
  0xb6   : > { %v327_v20 = vmul.f32 %v754_v19, %v325_v18  ;;  %vm332_vm3 = vweird.f32 %v754_v19 }
  0xb7   : > { %vm333_vm5 = vmor %vm331_vm4, %vm332_vm3 }
  0xb8   : > { %v328_v21 = vsub.f32 1.0, %v327_v20 }
  0xba   : > { %v329_v22 = vmul.f32 %v754_v19, %v328_v21 }
  0xbc   : > { %v330_v23 = vadd.f32 %v754_v19, %v329_v22 }
  0xbe   : > { %v334_v26 = vsel %vm333_vm5, %v754_v19, %v330_v23 }
  0xbf   : > { %v339_v28 = vsel %vm336_vm6, %v338_v27, %v334_v26 }
  0xc0   : > { %v358_v35 = vsub.f32 1.0, %v339_v28  ;;  %v368_v37 = vmul.f32 %v366_v34, %v339_v28 }
 0x116   : > { %v349_v29 = vpop.permute.xlu0 %348 }
 0x117   : > { %v351_v30 = vmul.f32 %v349_v29, %v339_v28 }
 0x119   : > { %353 = vrot.lane.b32.xlu1 %v351_v30, %s841_s7 }
 0x120   : > { %v280_v15 = vpop.f32.mrf.mxu0 }
 0x121   : > { %v281_v16 = vadd.f32 %v958_v12, %v280_v15 }
 0x18b   : > { %v354_v31 = vpop.permute.xlu1 %353 }
 0x18c   : > { %v356_v32 = vadd.f32 %v354_v31, %v276_v14 }
 0x18e   : > { %755 = vtanh.f32 %v356_v32 }
 0x194   : > { %v756_v33 = vpop.eup %755 }
 0x195   : > { %360 = vrot.lane.b32.xlu1 %v756_v33, %s842_s10 }
 0x207   : > { %v361_v36 = vpop.permute.xlu1 %360 }
 0x208   : > { %v363_v38 = vmul.f32 %v361_v36, %v358_v35 }
 0x20a   : > { %v963_v39 = vadd.f32 %v368_v37, %v363_v38 }
 0x20c   : > { %v375_v40 = vpack.c.bf16 %v963_v39, %v963_v39 }
 0x20e   : > { %377 = vrot.lane.b32.xlu2 %v375_v40, %s842_s10 }
 0x268   : > { %v378_v41 = vpop.permute.xlu2 %377 }
 0x269   : > { %684 = vmatmul.msk.bf16.vlgmr.msra.gmra.mxu2 %vm304_vm2, %v378_v41 }
 0x2ec   : > { %v391_v42 = vpop.f32.mrf.mxu2 }
 0x2ed   : > { %v415_v43 = vadd.f32 %v391_v42, %v951_v8  ;;  %v395_v47 = vadd.f32 %v391_v42, %v278_v46 }
 0x2ef   : > { %417 = vrot.lane.b32.xlu0 %v415_v43, %s841_s7  ;;  %v685_v48 = vmul.f32 -1.442695, %v395_v47  ;;  %v282_v47 = vpop.f32.mrf.mxu0 }
 0x2f1   : > { %757 = vpow2.f32 %v685_v48  ;;  %v283_v48 = vadd.f32 %v958_v12, %v282_v47 }
 0x2f4   : > { %v393_v44 = vpop.f32.mrf.mxu2 }
 0x2f7   : > { %v758_v49 = vpop.eup %757 }
 0x2f8   : > { %v399_v50 = vadd.f32 1.0, %v758_v49 }
 0x2fa   : > { %759 = vrcp.f32 %v399_v50  ;;  %v411_v56 = vand.u32 2147483648, %v399_v50  ;;  %vm405_vm8 = vweird.f32 %v399_v50  ;;  %v409_v57 = vand.u32 2147483647, %v399_v50 }
 0x2fc   : > { %v412_v59 = vor.u32 1.1754944e-38, %v411_v56  ;;  %vm410_vm10 = vcmp.eq.f32.partialorder %v409_v57, 8.507059e+37 }
 0x300   : > { %v760_v51 = vpop.eup %759 }
 0x301   : > { %v401_v52 = vmul.f32 %v760_v51, %v399_v50  ;;  %vm406_vm7 = vweird.f32 %v760_v51 }
 0x302   : > { %vm407_vm9 = vmor %vm405_vm8, %vm406_vm7 }
 0x303   : > { %v402_v53 = vsub.f32 1.0, %v401_v52 }
 0x305   : > { %v403_v54 = vmul.f32 %v760_v51, %v402_v53 }
 0x307   : > { %v404_v55 = vadd.f32 %v760_v51, %v403_v54 }
 0x309   : > { %v408_v58 = vsel %vm407_vm9, %v760_v51, %v404_v55 }
 0x30a   : > { %v413_v61 = vsel %vm410_vm10, %v412_v59, %v408_v58 }
 0x30b   : > { %v427_v2 = vsub.f32 1.0, %v413_v61  ;;  %v433_v4 = vmul.f32 %v413_v61, %v963_v39 }
 0x361   : > { %v418_v60 = vpop.permute.xlu0 %417 }
 0x362   : > { %v420_v62 = vmul.f32 %v418_v60, %v413_v61 }
 0x364   : > { %422 = vrot.lane.b32.xlu1 %v420_v62, %s841_s7 }
 0x3d6   : > { %v423_v63 = vpop.permute.xlu1 %422 }
 0x3d7   : > { %v425_v0 = vadd.f32 %v423_v63, %v278_v46 }
 0x3d9   : > { %761 = vtanh.f32 %v425_v0 }
 0x3df   : > { %v762_v1 = vpop.eup %761 }
 0x3e0   : > { %429 = vrot.lane.b32.xlu2 %v762_v1, %s842_s10 }
 0x43a   : > { %v430_v3 = vpop.permute.xlu2 %429 }
 0x43b   : > { %v432_v5 = vmul.f32 %v430_v3, %v427_v2 }
 0x43d   : > { %v975_v6 = vadd.f32 %v433_v4, %v432_v5 }
 0x43f   : > { %v441_v7 = vpack.c.bf16 %v975_v6, %v975_v6 }
 0x441   : > { %443 = vrot.lane.b32.xlu0 %v441_v7, %s842_s10 }
 0x4b3   : > { %v444_v10 = vpop.permute.xlu0 %443 }
 0x4b4   : > { %687 = vmatmul.msk.bf16.vlgmr.msra.gmra.mxu3 %vm304_vm2, %v444_v10 }
 0x537   : > { %v457_v11 = vpop.f32.mrf.mxu3 }
 0x538   : > { %v481_v13 = vadd.f32 %v457_v11, %v951_v8  ;;  %v461_v17 = vadd.f32 %v457_v11, %v281_v16 }
 0x53a   : > { %483 = vrot.lane.b32.xlu1 %v481_v13, %s841_s7  ;;  %v688_v18 = vmul.f32 -1.442695, %v461_v17 }
 0x53c   : > { %763 = vpow2.f32 %v688_v18 }
 0x53f   : > { %v459_v14 = vpop.f32.mrf.mxu3 }
 0x542   : > { %v764_v19 = vpop.eup %763 }
 0x543   : > { %v465_v20 = vadd.f32 1.0, %v764_v19 }
 0x545   : > { %765 = vrcp.f32 %v465_v20  ;;  %v477_v26 = vand.u32 2147483648, %v465_v20  ;;  %vm471_vm12 = vweird.f32 %v465_v20  ;;  %v475_v27 = vand.u32 2147483647, %v465_v20 }
 0x547   : > { %v478_v29 = vor.u32 1.1754944e-38, %v477_v26  ;;  %vm476_vm14 = vcmp.eq.f32.partialorder %v475_v27, 8.507059e+37 }
 0x54b   : > { %v766_v21 = vpop.eup %765 }
 0x54c   : > { %v467_v22 = vmul.f32 %v766_v21, %v465_v20  ;;  %vm472_vm11 = vweird.f32 %v766_v21 }
 0x54d   : > { %vm473_vm13 = vmor %vm471_vm12, %vm472_vm11 }
 0x54e   : > { %v468_v23 = vsub.f32 1.0, %v467_v22 }
 0x550   : > { %v469_v24 = vmul.f32 %v766_v21, %v468_v23 }
 0x552   : > { %v470_v25 = vadd.f32 %v766_v21, %v469_v24 }
 0x554   : > { %v474_v28 = vsel %vm473_vm13, %v766_v21, %v470_v25 }
 0x555   : > { %v479_v31 = vsel %vm476_vm14, %v478_v29, %v474_v28 }
 0x556   : > { %v493_v36 = vsub.f32 1.0, %v479_v31  ;;  %v499_v38 = vmul.f32 %v479_v31, %v975_v6 }
 0x5ac   : > { %v484_v30 = vpop.permute.xlu1 %483 }
 0x5ad   : > { %v486_v32 = vmul.f32 %v484_v30, %v479_v31 }
 0x5af   : > { %488 = vrot.lane.b32.xlu2 %v486_v32, %s841_s7 }
 0x609   : > { %v489_v33 = vpop.permute.xlu2 %488 }
 0x60a   : > { %v491_v34 = vadd.f32 %v489_v33, %v281_v16 }
 0x60c   : > { %767 = vtanh.f32 %v491_v34 }
 0x612   : > { %v768_v35 = vpop.eup %767 }
 0x613   : > { %495 = vrot.lane.b32.xlu0 %v768_v35, %s842_s10 }
 0x685   : > { %v496_v37 = vpop.permute.xlu0 %495 }
 0x686   : > { %v498_v40 = vmul.f32 %v496_v37, %v493_v36 }
 0x688   : > { %v500_v41 = vadd.f32 %v499_v38, %v498_v40 }
 0x68a   : > { %v507_v42 = vpack.c.bf16 %v500_v41, %v500_v41 }
 0x68c   : > { %509 = vrot.lane.b32.xlu1 %v507_v42, %s842_s10 }
 0x6fe   : > { %v510_v43 = vpop.permute.xlu1 %509 }
 0x6ff   : > { %690 = vmatmul.msk.bf16.vlgmr.msrb.gmra.mxu1 %vm304_vm2, %v510_v43 }
 0x77c   : > { %v523_v44 = vpop.f32.mrf.mxu1 }
 0x77d   : > { %v547_v45 = vadd.f32 %v523_v44, %v951_v8  ;;  %v527_v49 = vadd.f32 %v523_v44, %v283_v48 }
 0x77f   : > { %549 = vrot.lane.b32.xlu2 %v547_v45, %s841_s7  ;;  %v691_v50 = vmul.f32 -1.442695, %v527_v49 }
 0x781   : > { %769 = vpow2.f32 %v691_v50 }
 0x784   : > { %v525_v46 = vpop.f32.mrf.mxu1 }
 0x787   : > { %371 = vrot.lane.b32.xlu2 %v963_v39, %s842_s10  ;;  %v770_v51 = vpop.eup %769 }
 0x788   : > { %v531_v52 = vadd.f32 1.0, %v770_v51 }
 0x78a   : > { %771 = vrcp.f32 %v531_v52  ;;  %v543_v57 = vand.u32 2147483648, %v531_v52  ;;  %vm537_vm0 = vweird.f32 %v531_v52  ;;  %v541_v58 = vand.u32 2147483647, %v531_v52 }
 0x78c   : > { %v544_v12 = vor.u32 1.1754944e-38, %v543_v57  ;;  %vm542_vm3 = vcmp.eq.f32.partialorder %v541_v58, 8.507059e+37 }
 0x790   : > { %v772_v53 = vpop.eup %771 }
 0x791   : > { %v533_v54 = vmul.f32 %v772_v53, %v531_v52  ;;  %vm538_vm15 = vweird.f32 %v772_v53 }
 0x792   : > { %vm539_vm1 = vmor %vm537_vm0, %vm538_vm15 }
 0x793   : > { %v534_v55 = vsub.f32 1.0, %v533_v54 }
 0x795   : > { %v535_v8 = vmul.f32 %v772_v53, %v534_v55 }
 0x797   : > { %v536_v56 = vadd.f32 %v772_v53, %v535_v8 }
 0x799   : > { %v540_v39 = vsel %vm539_vm1, %v772_v53, %v536_v56 }
 0x79a   : > { %v545_v60 = vsel %vm542_vm3, %v544_v12, %v540_v39 }
 0x79b   : > { %v559_v3 = vsub.f32 1.0, %v545_v60  ;;  %v565_v5 = vmul.f32 %v545_v60, %v500_v41 }
 0x7d9   : > { %v550_v59 = vpop.permute.xlu2 %549 }
 0x7da   : > { %v552_v61 = vmul.f32 %v550_v59, %v545_v60 }
 0x7dc   : > { %554 = vrot.lane.b32.xlu0 %v552_v61, %s841_s7  ;;  %s795_s7 = scalar_lea.hbm %s1050_s5, 64 }
 0x7dd   : > { %p797_p2 = scmp.lt.s32.totalorder %s795_s7, %s791_s26 }
 0x7df   : > { %p798_p3 = por %p797_p2, %p796_p1 }
 0x7e1   : > { %v372_v62 = vpop.permute.xlu2 %371  ;;  %p799_p4 = pnand %p798_p3, %p794_p0 }
 0x7e2   : > { %374 = vst.msk [vmem:[%s932_s12] sm:$0xff] %vm304_vm2, %v372_v62 }
 0x7e4   : > { %436 = vrot.lane.b32.xlu0 %v975_v6, %s842_s10 }
 0x84e   : > { %v555_v63 = vpop.permute.xlu0 %554 }
 0x84f   : > { %v557_v0 = vadd.f32 %v555_v63, %v283_v48 }
 0x851   : > { %773 = vtanh.f32 %v557_v0 }
 0x856   : > { %v437_v1 = vpop.permute.xlu0 %436 }
 0x857   : > { %v774_v2 = vpop.eup %773  ;;  %686 = vst.msk [vmem:[%s932_s12 + $0x8] sm:$0xff] %vm304_vm2, %v437_v1 }
 0x858   : > { %561 = vrot.lane.b32.xlu1 %v774_v2, %s842_s10 }
 0x860   : > { %502 = vrot.lane.b32.xlu1 %v500_v41, %s842_s10 }
 0x8ca   : > { %v562_v4 = vpop.permute.xlu1 %561 }
 0x8cb   : > { %v564_v6 = vmul.f32 %v562_v4, %v559_v3 }
 0x8cd   : > { %v566_v7 = vadd.f32 %v565_v5, %v564_v6 }
 0x8cf   : > { %568 = vrot.lane.b32.xlu2 %v566_v7, %s842_s10 }
 0x8d2   : > { %v503_v9 = vpop.permute.xlu1 %502 }
 0x8d3   : > { %689 = vst.msk [vmem:[%s932_s12 + $0x10] sm:$0xff] %vm304_vm2, %v503_v9 }
 0x929   : > { %v569_v10 = vpop.permute.xlu2 %568 }
 0x92a   : > { %692 = vst.msk [vmem:[%s932_s12 + $0x18] sm:$0xff] %vm304_vm2, %v569_v10 }
 0x92b   : > { %573 = vst.msk [vmem:[#allocation2] sm:$0xff] %vm304_vm2, %v569_v10 }
 0x92c   : > { %802 = shalt.err (!%p799_p4)
}
 0x92d   : > { %s843_s30 = smov 128   ;;  %s844_s12 = smov 8  }
 0x92e   : > { %704 = dma.vmem_to_hbm [thread:$0]  (%p913_p5), %s588_s16, 512, %s590_s17, %s575_s23, %s843_s30, %s843_s30, %s844_s12  }
 0x92f PF: > { %p710_p7 = scmp.ge.s32.totalorder %s837_s21, 2  ;;  %s604_s10 = sand.u32 1, %s825_s18  }
 0x930   : > { %s605_s11 = scalar_lea.sflag [#allocation4], %s604_s10 }
 0x931   : > { %p707_p8 = pnand %p710_p7, %p917_p6 }
 0x933   : > { %p708_p9 = pneg %p707_p8 }
 0x935   : > { %820 = dma.done.wait (%p708_p9), %s605_s11, 512  }
 0x936   : > { %822 = vsyncadd (%p708_p9), %s605_s11, 4294966784  ;;  %p15_p10 = scmp.ge.s32.totalorder %s900_s24, 4   ;;  %s1053_s18 = smov %s829_s19 }
 0x937   : > { %s1054_s19 = smov %s833_s20  ;;  %s1055_s20 = smov %s911_s27 }
 0x938   : > { %s1056_s21 = smov %s900_s24  ;;  %17 = sbr.rel (!%p15_p10) target bundleno = 3 (0x3), region = 82 }
 0x93d   :  { %611 = vsyncpa [#allocation4], 1 }
 0x93e   :  { %613 = vsyncpa [#allocation4 + $0x1], 1 }

</bundles_post_ra>
